<compile_context>
chip_gen: v6e
topology: v6e:2x2x1
jax: 0.10.0
libtpu: 0.0.40
codegen_flags: <defaults>
</compile_context>

<pallas_src>
import functools

import jax
import jax.numpy as jnp
from jax.experimental import pallas as pl
from jax.experimental.pallas import tpu as pltpu


def _round_up(x, m):
    return (x + m - 1) // m * m


def spline_kernel(bias_ref, xp_ref, w_ref, o_ref):
    # bias_ref: (1, 1) scalar in SMEM
    # xp_ref:   (TM, KP) lane-dense packed tile of X_basis in VMEM
    # w_ref:    (KP, PACK) block-diagonal beta RHS in VMEM (replicated per step)
    # o_ref:    (TM, PACK) output tile
    acc = jnp.dot(xp_ref[...], w_ref[...],
                  preferred_element_type=jnp.float32)        # MXU, hidden under DMA
    o_ref[...] = (acc + bias_ref[0, 0]).astype(o_ref.dtype)


@functools.partial(jax.jit, static_argnames=("tm",))
def spline_forward(x_basis, beta, bias, tm=8192):
    """bias + x_basis @ beta, row-tiled, lane-dense packed, MXU contraction."""
    n, k = x_basis.shape
    x_basis = x_basis.astype(jnp.float32)
    beta = jnp.reshape(beta.astype(jnp.float32), (k, 1))
    bias_2d = jnp.reshape(bias.astype(jnp.float32), (1, 1))

    # ---- lane-density repack: (N, K) -> (N/pack, 128) when K divides 128 ----
    pack = 128 // k if (k <= 128 and 128 % k == 0) else 1
    kp = k * pack
    n_pad = _round_up(n, pack)
    if n_pad != n:
        x_basis = jnp.pad(x_basis, ((0, n_pad - n), (0, 0)))
    xp = jnp.reshape(x_basis, (n_pad // pack, kp))
    # W[g*k + j, g'] = beta[j] iff g == g'  (block-diagonal copy of beta)
    w = jnp.kron(jnp.eye(pack, dtype=jnp.float32), beta)      # (kp, pack)

    # ---- row-tile selection --------------------------------------------------
    n_packed = n_pad // pack
    if n_packed <= min(tm, 1024):
        tm_eff = n_packed                                      # single full tile
    else:
        # >= 2 grid steps (v7x: both TensorCores), 8-row aligned, capped at `tm`
        # (default 8192 packed rows = 4 MiB of HBM bytes per grid step).
        tm_eff = min(tm, _round_up(pl.cdiv(n_packed, 2), 8))
    grid = (pl.cdiv(n_packed, tm_eff),)

    cost = pl.CostEstimate(
        flops=2 * n_pad * kp,
        transcendentals=0,
        bytes_accessed=4 * (n_pad * k + kp * pack + n_pad),
    )

    out_packed = pl.pallas_call(
        spline_kernel,
        out_shape=jax.ShapeDtypeStruct((n_packed, pack), jnp.float32),
        grid_spec=pltpu.PrefetchScalarGridSpec(
            num_scalar_prefetch=0,
            grid=grid,
            in_specs=[
                pl.BlockSpec((1, 1), lambda i: (0, 0),
                             memory_space=pltpu.SMEM),          # bias scalar
                pl.BlockSpec((tm_eff, kp), lambda i: (i, 0)),   # packed X tile
                pl.BlockSpec((kp, pack), lambda i: (0, 0)),     # beta RHS (const)
            ],
            out_specs=pl.BlockSpec((tm_eff, pack), lambda i: (i, 0)),
        ),
        compiler_params=pltpu.CompilerParams(
            dimension_semantics=("parallel",)),
        cost_estimate=cost,
    )(bias_2d, xp, w)

    # (n_packed, pack) flattens row-major to the original (N, 1) row order.
    return jnp.reshape(out_packed, (n_pad, 1))[:n]


if __name__ == "__main__":
    num_basis = 32   # K
    n_rows = 200     # N (not a multiple of the tile -> partial tail tile)

    key = jax.random.PRNGKey(0)
    k_x, k_beta, k_bias = jax.random.split(key, 3)

    # Deterministic "parameters" (mirrors torch.randn(num_basis, 1) + scalar bias)
    beta = jax.random.normal(k_beta, (num_basis, 1), dtype=jnp.float32)
    bias = jax.random.normal(k_bias, (), dtype=jnp.float32)
    x_basis = jax.random.normal(k_x, (n_rows, num_basis), dtype=jnp.float32)

    # Small tile so the test runs a multi-step grid with a partial tail tile.
    out = spline_forward(x_basis, beta, bias, tm=16)
    out = jax.block_until_ready(out)

    ref = bias + jnp.sum(x_basis * beta[:, 0][None, :], axis=1, keepdims=True)
    assert out.shape == (n_rows, 1)
    assert jnp.allclose(out, ref, atol=1e-4, rtol=1e-4)

    # Second case: N not a multiple of the pack factor + default tile-size path
    # (exercises the zero-row padding and the >=2-step large-N grid selection).
    n2 = 4097
    x2 = jax.random.normal(jax.random.PRNGKey(1), (n2, num_basis), dtype=jnp.float32)
    out2 = jax.block_until_ready(spline_forward(x2, beta, bias))
    ref2 = bias + jnp.sum(x2 * beta[:, 0][None, :], axis=1, keepdims=True)
    assert out2.shape == (n2, 1)
    assert jnp.allclose(out2, ref2, atol=1e-4, rtol=1e-4)

    print("KERNEL_OK")
</pallas_src>

<mosaic_0001>
module attributes {stable_mosaic.version = 11 : i64} {
  func.func @spline_kernel(%arg0: i32, %arg1: memref<1x1xf32, #tpu.memory_space<smem>>, %arg2: memref<16x128xf32, #tpu.memory_space<vmem>>, %arg3: memref<128x4xf32, #tpu.memory_space<vmem>>, %arg4: memref<16x4xf32, #tpu.memory_space<vmem>>) attributes {dimension_semantics = [#tpu.dimension_semantics<parallel>], iteration_bounds = array<i64: 4>, scalar_prefetch = 0 : i64, scratch_operands = 0 : i64, tpu.core_type = #tpu.core_type<tc>, window_params = [{transform_indices = @transform_0, window_bounds = array<i64: 1, 1>}, {transform_indices = @transform_1, window_bounds = array<i64: 16, 128>}, {pipeline_mode = #tpu.pipeline_mode<synchronous>, transform_indices = @transform_2, window_bounds = array<i64: 128, 4>}, {transform_indices = @transform_3, window_bounds = array<i64: 16, 4>}]} {
    %c0 = arith.constant 0 : index
    %c0_0 = arith.constant 0 : index
    %0 = vector.load %arg2[%c0, %c0_0] : memref<16x128xf32, #tpu.memory_space<vmem>>, vector<16x128xf32>
    %c0_1 = arith.constant 0 : index
    %c0_2 = arith.constant 0 : index
    %1 = vector.load %arg3[%c0_1, %c0_2] : memref<128x4xf32, #tpu.memory_space<vmem>>, vector<128x4xf32>
    %cst = arith.constant dense<0.000000e+00> : vector<16x4xf32>
    %2 = tpu.matmul %0, %1, %cst {dimension_numbers = #tpu.dot_dimension_numbers<[1], [0], [0], [1], [0, 0, 1, 1], [], []>} : vector<16x128xf32>, vector<128x4xf32>, vector<16x4xf32> -> vector<16x4xf32>
    %c0_3 = arith.constant 0 : index
    %c0_4 = arith.constant 0 : index
    %3 = memref.load %arg1[%c0_3, %c0_4] : memref<1x1xf32, #tpu.memory_space<smem>>
    %4 = vector.broadcast %3 : f32 to vector<16x4xf32>
    %5 = arith.addf %2, %4 : vector<16x4xf32>
    %c0_5 = arith.constant 0 : index
    %c0_6 = arith.constant 0 : index
    %6 = vector.load %arg4[%c0_5, %c0_6] : memref<16x4xf32, #tpu.memory_space<vmem>>, vector<16x4xf32>
    tpu.vector_store %arg4[%c0_5, %c0_6], %5 {strides = array<i32>} : memref<16x4xf32, #tpu.memory_space<vmem>>, vector<16x4xf32>,
    return
  }
  func.func @transform_0(%arg0: i32) -> (i32, i32) {
    %c0_i32 = arith.constant 0 : i32
    %c0_i32_0 = arith.constant 0 : i32
    %c0_i32_1 = arith.constant 0 : i32
    return %c0_i32, %c0_i32_0 : i32, i32
  }
  func.func @transform_1(%arg0: i32) -> (i32, i32) {
    %c0_i32 = arith.constant 0 : i32
    %c0_i32_0 = arith.constant 0 : i32
    return %arg0, %c0_i32 : i32, i32
  }
  func.func @transform_2(%arg0: i32) -> (i32, i32) {
    %c0_i32 = arith.constant 0 : i32
    %c0_i32_0 = arith.constant 0 : i32
    %c0_i32_1 = arith.constant 0 : i32
    return %c0_i32, %c0_i32_0 : i32, i32
  }
  func.func @transform_3(%arg0: i32) -> (i32, i32) {
    %c0_i32 = arith.constant 0 : i32
    %c0_i32_0 = arith.constant 0 : i32
    return %arg0, %c0_i32 : i32, i32
  }
}

</mosaic_0001>

<bundles_post_ra>
// kernel: spline_forward.1
= control target key start
LH: loop header
LB: loop body
LE: loop exit
PB: predicated region body
PF: predicated region fallthrough
CT: control target
= control target key end

     0   :  { %s925_s0 = inlined_call_operand.<no memory space> [shape: f32[1,1], index: 0, kind: input, shape index: {}]   ;;  %s926_s1 = inlined_call_operand.vmem [shape: f32[50,128], index: 1, kind: input, shape index: {}]   ;;  %s927_s2 = inlined_call_operand.vmem [shape: f32[128,4], index: 2, kind: input, shape index: {}]   ;;  %s928_s3 = inlined_call_operand.vmem [shape: f32[50,4], index: 3, kind: output, shape index: {}]  }
   0x1   :  { %8 = sst [smem:[#allocation2]] %s925_s0 }
   0x2   :  { %s790_s14 = smov 0   ;;  %s792_s15 = smov 0  }
   0x3   :  { %s794_s16 = smov 0  }
   0x4 LB: > { %s803_s0 = sadd.s32 4294967295, %s733_s16   ;;  %s805_s17 = sadd.s32 1, %s733_s16   ;;  %s733_s16 = sphi %s794_s16, %s932_s16   ;;  %s729_s15 = sphi %s792_s15, %s931_s15   ;;  %s725_s14 = sphi %s790_s14, %s930_s14  }
   0x5   : > { %s86_s18 = ssub.s32 %s733_s16, %s805_s17  ;;  %s89_s19 = sadd.s32 1, %s729_s15 }
   0x6   : > { %p87_p0 = scmp.eq.s32.totalorder %s86_s18, 0  ;;  %p99_p1 = scmp.ne.s32.totalorder %s729_s15, %s725_s14 }
   0x7   : > { %p100_p2 = scmp.eq.s32.totalorder %s803_s0, 3  ;;  %p514_p3 = scmp.ge.s32.totalorder %s733_s16, 1 }
   0x8   : > { %s813_s20 = scalar_select %p87_p0, %s729_s15, %s89_s19  }
   0x9   : > { %p815_p4 = por %p100_p2, %p99_p1  ;;  %p147_p5 = scmp.lt.s32.totalorder %s733_s16, 5 }
   0xb   : > { %p148_p6 = pnand %p514_p3, %p147_p5 }
   0xc   : > { %s826_s26 = sshll.u32 (!%p148_p6), %s803_s0, 1  ;;  %s211_s13 = sld [smem:[#allocation2]] (!%p148_p6) }
   0xd   : > { %151 = sbr.rel (%p148_p6) target bundleno = 288 (0x120), region = 32  ;;  %p179_p7 = scmp.lt.s32.totalorder (!%p148_p6), %s826_s26, 6 }
   0xe   : > { %s171_s16 = sand.u32 (!%p148_p6), 1, %s725_s14  }
   0xf   : > { %s515_s18 = sshll.u32 (!%p148_p6), %s171_s16, 4 }
  0x10   : > { %s880_s19 = scalar_lea.vmem (!%p148_p6), [#allocation3], %s515_s18  }
  0x12   : > { %v210_v0 = vld [vmem:[%s927_s2 + $0x78] sm:$0xff]  ;;  %v209_v1 = vld [vmem:[%s927_s2 + $0x70] sm:$0xff]  ;;  %v208_v2 = vld [vmem:[%s927_s2 + $0x68] sm:$0xff]  ;;  %s180_s29 = scalar_select %p179_p7, %s826_s26, 6  ;;  %v212_v18 = vstv %s211_s13  ;;  %vm288_vm0 = vcmask 31744  }
  0x13   : > { %556 = vmatprep.subr.mxu0 %v210_v0  ;;  %v207_v3 = vld [vmem:[%s927_s2 + $0x60] sm:$0xff]  ;;  %v206_v4 = vld [vmem:[%s927_s2 + $0x58] sm:$0xff]  ;;  %v205_v6 = vld [vmem:[%s927_s2 + $0x50] sm:$0xff]  ;;  %s535_s14 = sshll.u32 (%p815_p4), %s803_s0, 4 }
  0x14   : > { %557 = vmatpush3.msra.mxu0 %v210_v0  ;;  %s517_s5 = sshll.u32 %s180_s29, 3  ;;  %v204_v7 = vld [vmem:[%s927_s2 + $0x48] sm:$0xff]  ;;  %v203_v8 = vld [vmem:[%s927_s2 + $0x40] sm:$0xff]  ;;  %v202_v9 = vld [vmem:[%s927_s2 + $0x38] sm:$0xff]  ;;  %s891_s24 = scalar_lea.vmem (%p815_p4), %s928_s3, %s535_s14  }
  0x15   : > { %558 = vmatprep.subr.mxu0 %v209_v1  ;;  %s842_s10 = scalar_lea.vmem %s926_s1, %s517_s5  ;;  %v201_v10 = vld [vmem:[%s927_s2 + $0x30] sm:$0xff]  ;;  %v200_v11 = vld [vmem:[%s927_s2 + $0x28] sm:$0xff]  ;;  %v199_v12 = vld [vmem:[%s927_s2 + $0x20] sm:$0xff] }
  0x16   : > { %559 = vmatpush3.msra.mxu0 %v209_v1  ;;  %v193_v5 = vld [vmem:[%s842_s10] sm:$0xff]  ;;  %v198_v13 = vld [vmem:[%s927_s2 + $0x18] sm:$0xff]  ;;  %v197_v14 = vld [vmem:[%s927_s2 + $0x10] sm:$0xff] }
  0x17   : > { %560 = vmatprep.subr.mxu0 %v208_v2  ;;  %588 = vmatprep.mubr.f32.mxu0 %v193_v5  ;;  %v196_v15 = vld [vmem:[%s927_s2 + $0x8] sm:$0xff]  ;;  %v195_v16 = vld [vmem:[%s927_s2] sm:$0xff] }
  0x18   : > { %561 = vmatpush3.msra.mxu0 %v208_v2  ;;  %v194_v17 = vld [vmem:[%s842_s10 + $0x8] sm:$0xff]  ;;  %s299_s10 = ssub.s32 (%p815_p4), 7, %s826_s26 }
  0x19   : > { %562 = vmatprep.subr.mxu0 %v207_v3  ;;  %p300_p8 = scmp.lt.s32.totalorder (%p815_p4), %s299_s10, 2 }
  0x1a   : > { %563 = vmatpush3.msra.mxu0 %v207_v3 }
  0x1b   : > { %564 = vmatprep.subr.mxu0 %v206_v4 }
  0x1c   : > { %565 = vmatpush3.msra.mxu0 %v206_v4 }
  0x1d   : > { %566 = vmatprep.subr.mxu0 %v205_v6 }
  0x1e   : > { %567 = vmatpush3.msra.mxu0 %v205_v6 }
  0x1f   : > { %568 = vmatprep.subr.mxu0 %v204_v7 }
  0x20   : > { %569 = vmatpush3.msra.mxu0 %v204_v7 }
  0x21   : > { %570 = vmatprep.subr.mxu0 %v203_v8 }
  0x22   : > { %571 = vmatpush3.msra.mxu0 %v203_v8 }
  0x23   : > { %572 = vmatprep.subr.mxu0 %v202_v9 }
  0x24   : > { %573 = vmatpush3.msra.mxu0 %v202_v9 }
  0x25   : > { %574 = vmatprep.subr.mxu0 %v201_v10 }
  0x26   : > { %575 = vmatpush3.msra.mxu0 %v201_v10 }
  0x27   : > { %576 = vmatprep.subr.mxu0 %v200_v11 }
  0x28   : > { %577 = vmatpush3.msra.mxu0 %v200_v11 }
  0x29   : > { %578 = vmatprep.subr.mxu0 %v199_v12 }
  0x2a   : > { %579 = vmatpush3.msra.mxu0 %v199_v12 }
  0x2b   : > { %580 = vmatprep.subr.mxu0 %v198_v13 }
  0x2c   : > { %581 = vmatpush3.msra.mxu0 %v198_v13 }
  0x2d   : > { %582 = vmatprep.subr.mxu0 %v197_v14 }
  0x2e   : > { %583 = vmatpush3.msra.mxu0 %v197_v14 }
  0x2f   : > { %584 = vmatprep.subr.mxu0 %v196_v15 }
  0x30   : > { %585 = vmatpush3.msra.mxu0 %v196_v15 }
  0x31   : > { %586 = vmatprep.subr.mxu0 %v195_v16 }
  0x32   : > { %587 = vmatpush3.msra.mxu0 %v195_v16 }
  0x33   : > { %589 = vmatmul.mubr.f32.vlgmr.msra.gmra.mxu0 %v194_v17 }
  0xf3   : > { %v590_v19 = vpop.f32.mrf.mxu0 }
  0xf4   : > { %v285_v20 = vadd.f32 %v590_v19, %v212_v18  ;;  %297 = sbr.rel (!%p815_p4) target bundleno = 288 (0x120), region = 36 }
  0xf5   : > { %v279_v21 = vpop.f32.mrf.mxu0 }
  0xf6   : > { %290 = vst.msk [vmem:[%s880_s19 + $0x8] sm:$0xff] %vm288_vm0, %v285_v20  ;;  %v280_v22 = vadd.f32 %v279_v21, %v212_v18 }
  0xf8   : > { %289 = vst.msk [vmem:[%s880_s19] sm:$0xff] %vm288_vm0, %v280_v22 }
  0xf9   : > { %s934_s10 = smov (!%p300_p8, %s299_s10), 2 }
  0xfa   : > { %s520_s25 = sshll.u32 %s934_s10, 7 }
  0xfb   : > { %p523_p9 = scmp.eq.s32.totalorder %s520_s25, 0 }
  0xfc   : > { %s897_s27 = sshrl.u32 (!%p523_p9), %s934_s10, 1 }
  0xfd   : > { %308 = sbr.rel (%p523_p9) target bundleno = 288 (0x120), region = 40  ;;  %p524_p10 = scmp.le.s32.totalorder (!%p523_p9), %s897_s27, 0 }
 0x102   : > { %467 = sbr.rel (%p524_p10) target bundleno = 271 (0x10f), region = 116  ;;  %s735_s0 = smov (!%p524_p10), %s891_s24  }
 0x103   : > { %s739_s21 = smov (!%p524_p10), %s880_s19   ;;  %s743_s26 = smov (!%p524_p10), 0  }
 0x104   : > { %s747_s28 = smov (!%p524_p10), 0  }
 0x107 LB: >> { %v373_v23 = vld [vmem:[%s741_s21] sm:$0xff]  ;;  %v375_v24 = vld [vmem:[%s741_s21 + $0x8] sm:$0xff]  ;;  %s377_s29 = sadd.s32 1, %s745_s26  ;;  %s367_s28 = sadd.s32 1, %s749_s28   ;;  %s749_s28 = sphi %s747_s28, %s367_s28   ;;  %s745_s26 = sphi %s743_s26, %s744_s26   ;;  %s741_s21 = sphi %s739_s21, %s382_s21   ;;  %s737_s0 = sphi %s735_s0, %s383_s0  }
 0x108   : >> { %374 = vst [vmem:[%s737_s0] sm:$0xff] %v373_v23  ;;  %376 = vst [vmem:[%s737_s0 + $0x8] sm:$0xff] %v375_v24  ;;  %p378_p11 = scmp.ge.s32.totalorder %s377_s29, %s897_s27  ;;  %p366_p12 = scmp.ge.s32.totalorder %s367_s28, %s897_s27 }
 0x10a   : >> { %s936_s29 = smov (%p378_p11, %s377_s29), 0  ;;  %369 = sbr.rel (!%p366_p12) target bundleno = 263 (0x107), region = 122 }
 0x10b   : >> { %s525_s30 = sshll.u32 %s936_s29, 4  ;;  %s744_s26 = smov %s936_s29  }
 0x10c   : >> { %s382_s21 = scalar_lea.vmem %s880_s19, %s525_s30 [#allocation3]   ;;  %s383_s0 = scalar_lea.vmem %s891_s24, %s525_s30  }
 0x10f PF: > { %s907_s4 = sand.u32 1, %s934_s10   ;;  %s536_s5 = sshll.u32 %s897_s27, 4 }
 0x110   : > { %s388_s6 = scalar_lea.vmem %s880_s19, %s536_s5 [#allocation3]   ;;  %s390_s7 = scalar_lea.vmem %s891_s24, %s536_s5  }
 0x111   : > { %p530_p13 = scmp.le.s32.totalorder %s907_s4, 0 }
 0x112   : > { %s751_s8 = smov (!%p530_p13), %s390_s7   ;;  %s755_s9 = smov (!%p530_p13), %s388_s6  }
 0x113   : > { %481 = sbr.rel (%p530_p13) target bundleno = 288 (0x120), region = 127  ;;  %s759_s11 = smov (!%p530_p13), 0  }
 0x114   : > { %s763_s12 = smov (!%p530_p13), 0  }
 0x118 LB: >> { %v400_v25 = vld [vmem:[%s757_s9] sm:$0xff]  ;;  %s402_s13 = sadd.s32 1, %s761_s11  ;;  %s394_s12 = sadd.s32 1, %s765_s12   ;;  %s765_s12 = sphi %s763_s12, %s394_s12   ;;  %s761_s11 = sphi %s759_s11, %s760_s11   ;;  %s757_s9 = sphi %s755_s9, %s407_s9   ;;  %s753_s8 = sphi %s751_s8, %s408_s8  }
 0x119   : >> { %401 = vst [vmem:[%s753_s8] sm:$0xff] %v400_v25  ;;  %p403_p0 = scmp.ge.s32.totalorder %s402_s13, %s907_s4  ;;  %p393_p1 = scmp.ge.s32.totalorder %s394_s12, %s907_s4 }
 0x11b   : >> { %s938_s13 = smov (%p403_p0, %s402_s13), 0  ;;  %396 = sbr.rel (!%p393_p1) target bundleno = 280 (0x118), region = 133 }
 0x11c   : >> { %s531_s16 = sshll.u32 %s938_s13, 3  ;;  %s760_s11 = smov %s938_s13  }
 0x11d   : >> { %s407_s9 = scalar_lea.vmem %s388_s6, %s531_s16 [#allocation3]   ;;  %s408_s8 = scalar_lea.vmem %s390_s7, %s531_s16  }
 0x120 PF: > { %p11_p2 = scmp.ge.s32.totalorder %s805_s17, 6   ;;  %s930_s14 = smov %s729_s15 }
 0x121   : > { %s931_s15 = smov %s813_s20  ;;  %s932_s16 = smov %s805_s17 }
 0x122   :  { %13 = sbr.rel (!%p11_p2) target bundleno = 4 (0x4), region = 144 }

</bundles_post_ra>
